<compile_context>
chip_gen: v5e
topology: v5e:2x2
jax: 0.10.0
libtpu: 0.0.40
codegen_flags: <defaults>
</compile_context>

<pallas_src>
import functools
import math

import jax
import jax.numpy as jnp
from jax import lax
from jax.experimental import pallas as pl
from jax.experimental.pallas import tpu as pltpu


# ----------------------------------------------------------------------------
# Pallas kernel: single invocation, class-major ("lane-dense") layout [C, N].
#   hop 0    : cur = zT (MLP output, computed in XLA) ; acc = weighted(zT)
#   hop 1..K : cur <- cur @ A_hat^T ; acc += sigmoid(score(cur)) * cur
#   finalize : log_softmax over classes, store [C, N]
# ----------------------------------------------------------------------------
def dagnn_prop_kernel(zT_ref, aT_ref, wp_ref, bp_ref, out_ref,
                      cur_ref, acc_ref, *, K):
    wp = wp_ref[...]            # [C, 1] f32
    bp = bp_ref[0, 0]           # scalar f32 from SMEM

    def weighted(z):            # z: [C, N] f32 (nodes on the 128-wide lane axis)
        # retain score: VPU multiply + sublane (XLU) reduce, sigmoid on EUP.
        s = jax.nn.sigmoid(jnp.sum(wp * z, axis=0, keepdims=True) + bp)  # [1, N]
        return s * z

    z = zT_ref[...]                               # hop 0 prediction
    acc_ref[...] = weighted(z)
    cur_ref[...] = z.astype(jnp.bfloat16)         # bf16 hop state for the MXU

    def hop(_, carry):
        # cur' = cur @ A_hat^T  (class-major equivalent of A_hat @ cur).
        # bf16 operands, f32 accumulation.
        nz = jnp.dot(cur_ref[...], aT_ref[...],
                     preferred_element_type=jnp.float32)                  # [C, N]
        acc_ref[...] = acc_ref[...] + weighted(nz)
        cur_ref[...] = nz.astype(jnp.bfloat16)    # cast folded into the store
        return carry

    lax.fori_loop(0, K, hop, 0, unroll=True)

    o = acc_ref[...]                              # [C, N] f32
    m = jnp.max(o, axis=0, keepdims=True)
    lse = jnp.log(jnp.sum(jnp.exp(o - m), axis=0, keepdims=True)) + m
    out_ref[...] = o - lse


# ----------------------------------------------------------------------------
# Glue: gcn_norm (add self loops + symmetric normalization) -> dense A_hat^T,
# built directly in transposed [source, target] layout, optionally zero-padded.
# ----------------------------------------------------------------------------
def build_normalized_adjacency_T(edge_index, num_nodes, padded_nodes=None):
    row = edge_index[0]                       # source
    col = edge_index[1]                       # target
    # add_remaining_self_loops with fill_value=1.0 (raw edge list has no
    # self loops, so every node receives one self loop of weight 1).
    self_idx = jnp.arange(num_nodes, dtype=edge_index.dtype)
    row = jnp.concatenate([row, self_idx])
    col = jnp.concatenate([col, self_idx])
    w = jnp.ones(row.shape[0], jnp.float32)

    deg = jnp.zeros((num_nodes,), jnp.float32).at[col].add(w)
    deg_inv_sqrt = jnp.where(deg > 0, lax.rsqrt(deg), 0.0)
    norm = deg_inv_sqrt[row] * w * deg_inv_sqrt[col]

    n_pad = num_nodes if padded_nodes is None else padded_nodes
    # A_hat[target, source] aggregates norm * x[source] at node target, so the
    # transpose A_hat^T[source, target] is exactly the .at[row, col] scatter.
    return jnp.zeros((n_pad, n_pad), jnp.float32).at[row, col].add(norm)


def _nbytes(shape, dtype):
    return math.prod(shape) * jnp.dtype(dtype).itemsize


def _vmem_budget_bytes():
    cap = 128 << 20                                       # v5e/v6e physical VMEM
    try:
        cap = int(pltpu.get_tpu_info().vmem_capacity_bytes)   # 64 MiB on v7x
    except Exception:
        pass
    return (cap * 7) // 8                                 # headroom for Mosaic


# ----------------------------------------------------------------------------
# Wrapper
# ----------------------------------------------------------------------------
def dagnn_forward(x, edge_index, params, K):
    N, _ = x.shape
    C = params["w2"].shape[1]
    Np = ((N + 127) // 128) * 128                 # lane-align the node axis

    # MLP hoisted to plain XLA (used once); keeps x/W1/W2 out of VMEM so the
    # budget goes to a resident A_hat^T.  Dropout is identity at inference.
    h = jax.nn.relu(jnp.dot(x, params["w1"],
                            precision=lax.Precision.HIGHEST) + params["b1"])
    z = jnp.dot(h, params["w2"], precision=lax.Precision.HIGHEST) + params["b2"]
    zT = jnp.zeros((C, Np), jnp.float32).at[:, :N].set(z.T)   # class-major, padded

    # A_hat^T built directly in transposed layout, zero-padded to Np, bf16 for
    # the MXU (f32 accumulation inside the kernel).
    aT = build_normalized_adjacency_T(edge_index, N, Np).astype(jnp.bfloat16)
    wp = params["wp"].astype(jnp.float32)                     # [C, 1]
    bp = params["bp"].astype(jnp.float32)                     # [1, 1] -> SMEM

    vmem_need = (_nbytes((Np, Np), jnp.bfloat16)        # resident A_hat^T
                 + 3 * _nbytes((C, Np), jnp.float32)    # zT + out + acc
                 + _nbytes((C, Np), jnp.bfloat16)       # cur (bf16 hop state)
                 + (2 << 20))                           # headroom
    budget = _vmem_budget_bytes()
    # TODO(synk): if vmem_need > budget (A_hat^T no longer VMEM-resident),
    # dispatch to a column-tiled streaming variant with block-sparse skipping of
    # zero A_hat tiles (scalar-prefetch index maps); on v7x additionally split
    # the node axis across both TensorCores.
    vmem_limit = int(min(max(vmem_need, 16 << 20), budget))

    vmem = pltpu.MemorySpace.VMEM
    smem = pltpu.MemorySpace.SMEM
    outT = pl.pallas_call(
        functools.partial(dagnn_prop_kernel, K=K),
        out_shape=jax.ShapeDtypeStruct((C, Np), jnp.float32),
        in_specs=[
            pl.BlockSpec(memory_space=vmem),    # zT  (whole array, single-buffer)
            pl.BlockSpec(memory_space=vmem),    # aT  (resident across all hops)
            pl.BlockSpec(memory_space=vmem),    # wp
            pl.BlockSpec(memory_space=smem),    # bp scalar
        ],
        out_specs=pl.BlockSpec(memory_space=vmem),     # lane-dense [C, Np]
        scratch_shapes=[
            pltpu.VMEM((C, Np), jnp.bfloat16),  # cur (hop state)
            pltpu.VMEM((C, Np), jnp.float32),   # acc (sigmoid-weighted sum)
        ],
        compiler_params=pltpu.CompilerParams(vmem_limit_bytes=vmem_limit),
    )(zT, aT, wp, bp)

    return outT[:, :N].T                        # back to node-major [N, C]


def init_params(key, num_features, hidden, num_classes):
    """Deterministic PyTorch-Linear-style init (uniform +/- 1/sqrt(fan_in))."""
    ks = jax.random.split(key, 6)

    def unif(k, shape, fan_in):
        bound = 1.0 / jnp.sqrt(jnp.float32(fan_in))
        return jax.random.uniform(k, shape, jnp.float32, -bound, bound)

    return {
        "w1": unif(ks[0], (num_features, hidden), num_features),
        "b1": unif(ks[1], (1, hidden), num_features),
        "w2": unif(ks[2], (hidden, num_classes), hidden),
        "b2": unif(ks[3], (1, num_classes), hidden),
        "wp": unif(ks[4], (num_classes, 1), num_classes),
        "bp": unif(ks[5], (1, 1), num_classes),
    }


# ----------------------------------------------------------------------------
# References.
#   * mirrored: same arithmetic as the kernel (f32 MLP, bf16 propagation
#     operands, f32 accumulation)  -> tight tolerance.
#   * f32     : pure-f32 PyTorch-equivalent forward -> loose tolerance (bounds
#     the bf16 drift vs the true module).
# ----------------------------------------------------------------------------
def dagnn_reference_mirrored(x, edge_index, params, K):
    N = x.shape[0]
    A = build_normalized_adjacency_T(edge_index, N).T.astype(jnp.bfloat16)
    h = jax.nn.relu(jnp.dot(x, params["w1"],
                            precision=lax.Precision.HIGHEST) + params["b1"])
    z = jnp.dot(h, params["w2"], precision=lax.Precision.HIGHEST) + params["b2"]
    wp = params["wp"][:, 0]
    bp = params["bp"][0, 0]

    def weighted(v):                                              # [N, C]
        s = jax.nn.sigmoid(jnp.sum(v * wp, axis=1, keepdims=True) + bp)
        return s * v

    acc = weighted(z)
    cur = z.astype(jnp.bfloat16)
    for _ in range(K):
        nz = jnp.dot(A, cur, preferred_element_type=jnp.float32)
        acc = acc + weighted(nz)
        cur = nz.astype(jnp.bfloat16)
    return jax.nn.log_softmax(acc, axis=1)


def dagnn_reference_f32(x, edge_index, params, K):
    N = x.shape[0]
    A = build_normalized_adjacency_T(edge_index, N).T             # A_hat [tgt, src]
    h = jax.nn.relu(jnp.dot(x, params["w1"],
                            precision=lax.Precision.HIGHEST) + params["b1"])
    z = jnp.dot(h, params["w2"], precision=lax.Precision.HIGHEST) + params["b2"]
    preds = [z]
    cur = z
    for _ in range(K):
        cur = jnp.dot(A, cur, precision=lax.Precision.HIGHEST)
        preds.append(cur)
    pps = jnp.stack(preds, axis=1)                                # [N, K+1, C]
    logit = jnp.sum(pps * params["wp"][:, 0], axis=-1) + params["bp"][0, 0]
    score = jax.nn.sigmoid(logit)                                 # [N, K+1]
    out = jnp.sum(score[..., None] * pps, axis=1)                 # [N, C]
    return jax.nn.log_softmax(out, axis=1)


if __name__ == "__main__":
    # Small shapes consistent with the module:
    N_NODES = 64          # graph nodes
    NUM_FEATURES = 32     # dataset.num_features
    HIDDEN = 32           # args.hidden
    NUM_CLASSES = 8       # dataset.num_classes
    K = 4                 # args.num_layers
    N_EDGES = 128

    key = jax.random.PRNGKey(0)
    k_x, k_src, k_dst, k_p = jax.random.split(key, 4)

    x = jax.random.normal(k_x, (N_NODES, NUM_FEATURES), jnp.float32)
    src = jax.random.randint(k_src, (N_EDGES,), 0, N_NODES, jnp.int32)
    # offset destination so no self loops are present in the raw edge list
    dst = (src + 1 + jax.random.randint(k_dst, (N_EDGES,), 0, N_NODES - 1,
                                        jnp.int32)) % N_NODES
    edge_index = jnp.stack([src, dst], axis=0)           # [2, E]

    params = init_params(k_p, NUM_FEATURES, HIDDEN, NUM_CLASSES)

    out = dagnn_forward(x, edge_index, params, K)
    out = jax.block_until_ready(out)
    assert out.shape == (N_NODES, NUM_CLASSES)
    assert bool(jnp.all(jnp.isfinite(out)))

    ref_tight = dagnn_reference_mirrored(x, edge_index, params, K)
    assert jnp.allclose(out, ref_tight, atol=5e-3, rtol=5e-3), \
        "mismatch vs bf16-mirrored reference"

    ref_f32 = dagnn_reference_f32(x, edge_index, params, K)
    assert jnp.allclose(out, ref_f32, atol=5e-2, rtol=5e-2), \
        "mismatch vs f32 reference"

    print("KERNEL_OK")
</pallas_src>

<mosaic_0001>
module attributes {stable_mosaic.version = 11 : i64} {
  func.func @dagnn_prop_kernel(%arg0: memref<8x128xf32, #tpu.memory_space<vmem>>, %arg1: memref<128x128xbf16, #tpu.memory_space<vmem>>, %arg2: memref<8x1xf32, #tpu.memory_space<vmem>>, %arg3: memref<1x1xf32, #tpu.memory_space<smem>>, %arg4: memref<8x128xf32, #tpu.memory_space<vmem>>, %arg5: memref<8x128xbf16, #tpu.memory_space<vmem>>, %arg6: memref<8x128xf32, #tpu.memory_space<vmem>>) attributes {dimension_semantics = [], scalar_prefetch = 0 : i64, scratch_operands = 2 : i64, tpu.core_type = #tpu.core_type<tc>} {
    %c0 = arith.constant 0 : index
    %c0_0 = arith.constant 0 : index
    %0 = vector.load %arg2[%c0, %c0_0] : memref<8x1xf32, #tpu.memory_space<vmem>>, vector<8x1xf32>
    %c0_1 = arith.constant 0 : index
    %c0_2 = arith.constant 0 : index
    %1 = memref.load %arg3[%c0_1, %c0_2] : memref<1x1xf32, #tpu.memory_space<smem>>
    %c0_3 = arith.constant 0 : index
    %c0_4 = arith.constant 0 : index
    %2 = vector.load %arg0[%c0_3, %c0_4] : memref<8x128xf32, #tpu.memory_space<vmem>>, vector<8x128xf32>
    %3 = vector.broadcast %0 : vector<8x1xf32> to vector<8x128xf32>
    %4 = arith.mulf %3, %2 : vector<8x128xf32>
    %cst = arith.constant dense<0.000000e+00> : vector<128xf32>
    %5 = vector.multi_reduction <add>, %4, %cst [0] : vector<8x128xf32> to vector<128xf32>
    %6 = vector.shape_cast %5 : vector<128xf32> to vector<1x128xf32>
    %7 = vector.broadcast %1 : f32 to vector<1x128xf32>
    %8 = arith.addf %6, %7 : vector<1x128xf32>
    %9 = arith.negf %8 : vector<1x128xf32>
    %10 = math.exp %9 : vector<1x128xf32>
    %cst_5 = arith.constant 1.000000e+00 : f32
    %11 = vector.broadcast %cst_5 : f32 to vector<1x128xf32>
    %12 = arith.addf %11, %10 : vector<1x128xf32>
    %13 = arith.divf %11, %12 : vector<1x128xf32>
    %14 = vector.broadcast %13 : vector<1x128xf32> to vector<8x128xf32>
    %15 = arith.mulf %14, %2 : vector<8x128xf32>
    %c0_6 = arith.constant 0 : index
    %c0_7 = arith.constant 0 : index
    %16 = vector.load %arg6[%c0_6, %c0_7] : memref<8x128xf32, #tpu.memory_space<vmem>>, vector<8x128xf32>
    tpu.vector_store %arg6[%c0_6, %c0_7], %15 {strides = array<i32>} : memref<8x128xf32, #tpu.memory_space<vmem>>, vector<8x128xf32>,
    %17 = arith.truncf %2 : vector<8x128xf32> to vector<8x128xbf16>
    %c0_8 = arith.constant 0 : index
    %c0_9 = arith.constant 0 : index
    %18 = vector.load %arg5[%c0_8, %c0_9] : memref<8x128xbf16, #tpu.memory_space<vmem>>, vector<8x128xbf16>
    tpu.vector_store %arg5[%c0_8, %c0_9], %17 {strides = array<i32>} : memref<8x128xbf16, #tpu.memory_space<vmem>>, vector<8x128xbf16>,
    %c0_i32 = arith.constant 0 : i32
    %c0_10 = arith.constant 0 : index
    %c0_11 = arith.constant 0 : index
    %19 = vector.load %arg5[%c0_10, %c0_11] : memref<8x128xbf16, #tpu.memory_space<vmem>>, vector<8x128xbf16>
    %c0_12 = arith.constant 0 : index
    %c0_13 = arith.constant 0 : index
    %20 = vector.load %arg1[%c0_12, %c0_13] : memref<128x128xbf16, #tpu.memory_space<vmem>>, vector<128x128xbf16>
    %cst_14 = arith.constant dense<0.000000e+00> : vector<8x128xf32>
    %21 = tpu.matmul %19, %20, %cst_14 {dimension_numbers = #tpu.dot_dimension_numbers<[1], [0], [0], [1], [0, 0, 1, 1], [], []>} : vector<8x128xbf16>, vector<128x128xbf16>, vector<8x128xf32> -> vector<8x128xf32>
    %c0_15 = arith.constant 0 : index
    %c0_16 = arith.constant 0 : index
    %22 = vector.load %arg6[%c0_15, %c0_16] : memref<8x128xf32, #tpu.memory_space<vmem>>, vector<8x128xf32>
    %23 = vector.broadcast %0 : vector<8x1xf32> to vector<8x128xf32>
    %24 = arith.mulf %23, %21 : vector<8x128xf32>
    %cst_17 = arith.constant dense<0.000000e+00> : vector<128xf32>
    %25 = vector.multi_reduction <add>, %24, %cst_17 [0] : vector<8x128xf32> to vector<128xf32>
    %26 = vector.shape_cast %25 : vector<128xf32> to vector<1x128xf32>
    %27 = vector.broadcast %1 : f32 to vector<1x128xf32>
    %28 = arith.addf %26, %27 : vector<1x128xf32>
    %29 = arith.negf %28 : vector<1x128xf32>
    %30 = math.exp %29 : vector<1x128xf32>
    %cst_18 = arith.constant 1.000000e+00 : f32
    %31 = vector.broadcast %cst_18 : f32 to vector<1x128xf32>
    %32 = arith.addf %31, %30 : vector<1x128xf32>
    %33 = arith.divf %31, %32 : vector<1x128xf32>
    %34 = vector.broadcast %33 : vector<1x128xf32> to vector<8x128xf32>
    %35 = arith.mulf %34, %21 : vector<8x128xf32>
    %36 = arith.addf %22, %35 : vector<8x128xf32>
    %c0_19 = arith.constant 0 : index
    %c0_20 = arith.constant 0 : index
    %37 = vector.load %arg6[%c0_19, %c0_20] : memref<8x128xf32, #tpu.memory_space<vmem>>, vector<8x128xf32>
    tpu.vector_store %arg6[%c0_19, %c0_20], %36 {strides = array<i32>} : memref<8x128xf32, #tpu.memory_space<vmem>>, vector<8x128xf32>,
    %38 = arith.truncf %21 : vector<8x128xf32> to vector<8x128xbf16>
    %c0_21 = arith.constant 0 : index
    %c0_22 = arith.constant 0 : index
    %39 = vector.load %arg5[%c0_21, %c0_22] : memref<8x128xbf16, #tpu.memory_space<vmem>>, vector<8x128xbf16>
    tpu.vector_store %arg5[%c0_21, %c0_22], %38 {strides = array<i32>} : memref<8x128xbf16, #tpu.memory_space<vmem>>, vector<8x128xbf16>,
    %c1_i32 = arith.constant 1 : i32
    %c0_23 = arith.constant 0 : index
    %c0_24 = arith.constant 0 : index
    %40 = vector.load %arg5[%c0_23, %c0_24] : memref<8x128xbf16, #tpu.memory_space<vmem>>, vector<8x128xbf16>
    %c0_25 = arith.constant 0 : index
    %c0_26 = arith.constant 0 : index
    %41 = vector.load %arg1[%c0_25, %c0_26] : memref<128x128xbf16, #tpu.memory_space<vmem>>, vector<128x128xbf16>
    %cst_27 = arith.constant dense<0.000000e+00> : vector<8x128xf32>
    %42 = tpu.matmul %40, %41, %cst_27 {dimension_numbers = #tpu.dot_dimension_numbers<[1], [0], [0], [1], [0, 0, 1, 1], [], []>} : vector<8x128xbf16>, vector<128x128xbf16>, vector<8x128xf32> -> vector<8x128xf32>
    %c0_28 = arith.constant 0 : index
    %c0_29 = arith.constant 0 : index
    %43 = vector.load %arg6[%c0_28, %c0_29] : memref<8x128xf32, #tpu.memory_space<vmem>>, vector<8x128xf32>
    %44 = vector.broadcast %0 : vector<8x1xf32> to vector<8x128xf32>
    %45 = arith.mulf %44, %42 : vector<8x128xf32>
    %cst_30 = arith.constant dense<0.000000e+00> : vector<128xf32>
    %46 = vector.multi_reduction <add>, %45, %cst_30 [0] : vector<8x128xf32> to vector<128xf32>
    %47 = vector.shape_cast %46 : vector<128xf32> to vector<1x128xf32>
    %48 = vector.broadcast %1 : f32 to vector<1x128xf32>
    %49 = arith.addf %47, %48 : vector<1x128xf32>
    %50 = arith.negf %49 : vector<1x128xf32>
    %51 = math.exp %50 : vector<1x128xf32>
    %cst_31 = arith.constant 1.000000e+00 : f32
    %52 = vector.broadcast %cst_31 : f32 to vector<1x128xf32>
    %53 = arith.addf %52, %51 : vector<1x128xf32>
    %54 = arith.divf %52, %53 : vector<1x128xf32>
    %55 = vector.broadcast %54 : vector<1x128xf32> to vector<8x128xf32>
    %56 = arith.mulf %55, %42 : vector<8x128xf32>
    %57 = arith.addf %43, %56 : vector<8x128xf32>
    %c0_32 = arith.constant 0 : index
    %c0_33 = arith.constant 0 : index
    %58 = vector.load %arg6[%c0_32, %c0_33] : memref<8x128xf32, #tpu.memory_space<vmem>>, vector<8x128xf32>
    tpu.vector_store %arg6[%c0_32, %c0_33], %57 {strides = array<i32>} : memref<8x128xf32, #tpu.memory_space<vmem>>, vector<8x128xf32>,
    %59 = arith.truncf %42 : vector<8x128xf32> to vector<8x128xbf16>
    %c0_34 = arith.constant 0 : index
    %c0_35 = arith.constant 0 : index
    %60 = vector.load %arg5[%c0_34, %c0_35] : memref<8x128xbf16, #tpu.memory_space<vmem>>, vector<8x128xbf16>
    tpu.vector_store %arg5[%c0_34, %c0_35], %59 {strides = array<i32>} : memref<8x128xbf16, #tpu.memory_space<vmem>>, vector<8x128xbf16>,
    %c2_i32 = arith.constant 2 : i32
    %c0_36 = arith.constant 0 : index
    %c0_37 = arith.constant 0 : index
    %61 = vector.load %arg5[%c0_36, %c0_37] : memref<8x128xbf16, #tpu.memory_space<vmem>>, vector<8x128xbf16>
    %c0_38 = arith.constant 0 : index
    %c0_39 = arith.constant 0 : index
    %62 = vector.load %arg1[%c0_38, %c0_39] : memref<128x128xbf16, #tpu.memory_space<vmem>>, vector<128x128xbf16>
    %cst_40 = arith.constant dense<0.000000e+00> : vector<8x128xf32>
    %63 = tpu.matmul %61, %62, %cst_40 {dimension_numbers = #tpu.dot_dimension_numbers<[1], [0], [0], [1], [0, 0, 1, 1], [], []>} : vector<8x128xbf16>, vector<128x128xbf16>, vector<8x128xf32> -> vector<8x128xf32>
    %c0_41 = arith.constant 0 : index
    %c0_42 = arith.constant 0 : index
    %64 = vector.load %arg6[%c0_41, %c0_42] : memref<8x128xf32, #tpu.memory_space<vmem>>, vector<8x128xf32>
    %65 = vector.broadcast %0 : vector<8x1xf32> to vector<8x128xf32>
    %66 = arith.mulf %65, %63 : vector<8x128xf32>
    %cst_43 = arith.constant dense<0.000000e+00> : vector<128xf32>
    %67 = vector.multi_reduction <add>, %66, %cst_43 [0] : vector<8x128xf32> to vector<128xf32>
    %68 = vector.shape_cast %67 : vector<128xf32> to vector<1x128xf32>
    %69 = vector.broadcast %1 : f32 to vector<1x128xf32>
    %70 = arith.addf %68, %69 : vector<1x128xf32>
    %71 = arith.negf %70 : vector<1x128xf32>
    %72 = math.exp %71 : vector<1x128xf32>
    %cst_44 = arith.constant 1.000000e+00 : f32
    %73 = vector.broadcast %cst_44 : f32 to vector<1x128xf32>
    %74 = arith.addf %73, %72 : vector<1x128xf32>
    %75 = arith.divf %73, %74 : vector<1x128xf32>
    %76 = vector.broadcast %75 : vector<1x128xf32> to vector<8x128xf32>
    %77 = arith.mulf %76, %63 : vector<8x128xf32>
    %78 = arith.addf %64, %77 : vector<8x128xf32>
    %c0_45 = arith.constant 0 : index
    %c0_46 = arith.constant 0 : index
    %79 = vector.load %arg6[%c0_45, %c0_46] : memref<8x128xf32, #tpu.memory_space<vmem>>, vector<8x128xf32>
    tpu.vector_store %arg6[%c0_45, %c0_46], %78 {strides = array<i32>} : memref<8x128xf32, #tpu.memory_space<vmem>>, vector<8x128xf32>,
    %80 = arith.truncf %63 : vector<8x128xf32> to vector<8x128xbf16>
    %c0_47 = arith.constant 0 : index
    %c0_48 = arith.constant 0 : index
    %81 = vector.load %arg5[%c0_47, %c0_48] : memref<8x128xbf16, #tpu.memory_space<vmem>>, vector<8x128xbf16>
    tpu.vector_store %arg5[%c0_47, %c0_48], %80 {strides = array<i32>} : memref<8x128xbf16, #tpu.memory_space<vmem>>, vector<8x128xbf16>,
    %c3_i32 = arith.constant 3 : i32
    %c0_49 = arith.constant 0 : index
    %c0_50 = arith.constant 0 : index
    %82 = vector.load %arg5[%c0_49, %c0_50] : memref<8x128xbf16, #tpu.memory_space<vmem>>, vector<8x128xbf16>
    %c0_51 = arith.constant 0 : index
    %c0_52 = arith.constant 0 : index
    %83 = vector.load %arg1[%c0_51, %c0_52] : memref<128x128xbf16, #tpu.memory_space<vmem>>, vector<128x128xbf16>
    %cst_53 = arith.constant dense<0.000000e+00> : vector<8x128xf32>
    %84 = tpu.matmul %82, %83, %cst_53 {dimension_numbers = #tpu.dot_dimension_numbers<[1], [0], [0], [1], [0, 0, 1, 1], [], []>} : vector<8x128xbf16>, vector<128x128xbf16>, vector<8x128xf32> -> vector<8x128xf32>
    %c0_54 = arith.constant 0 : index
    %c0_55 = arith.constant 0 : index
    %85 = vector.load %arg6[%c0_54, %c0_55] : memref<8x128xf32, #tpu.memory_space<vmem>>, vector<8x128xf32>
    %86 = vector.broadcast %0 : vector<8x1xf32> to vector<8x128xf32>
    %87 = arith.mulf %86, %84 : vector<8x128xf32>
    %cst_56 = arith.constant dense<0.000000e+00> : vector<128xf32>
    %88 = vector.multi_reduction <add>, %87, %cst_56 [0] : vector<8x128xf32> to vector<128xf32>
    %89 = vector.shape_cast %88 : vector<128xf32> to vector<1x128xf32>
    %90 = vector.broadcast %1 : f32 to vector<1x128xf32>
    %91 = arith.addf %89, %90 : vector<1x128xf32>
    %92 = arith.negf %91 : vector<1x128xf32>
    %93 = math.exp %92 : vector<1x128xf32>
    %cst_57 = arith.constant 1.000000e+00 : f32
    %94 = vector.broadcast %cst_57 : f32 to vector<1x128xf32>
    %95 = arith.addf %94, %93 : vector<1x128xf32>
    %96 = arith.divf %94, %95 : vector<1x128xf32>
    %97 = vector.broadcast %96 : vector<1x128xf32> to vector<8x128xf32>
    %98 = arith.mulf %97, %84 : vector<8x128xf32>
    %99 = arith.addf %85, %98 : vector<8x128xf32>
    %c0_58 = arith.constant 0 : index
    %c0_59 = arith.constant 0 : index
    %100 = vector.load %arg6[%c0_58, %c0_59] : memref<8x128xf32, #tpu.memory_space<vmem>>, vector<8x128xf32>
    tpu.vector_store %arg6[%c0_58, %c0_59], %99 {strides = array<i32>} : memref<8x128xf32, #tpu.memory_space<vmem>>, vector<8x128xf32>,
    %101 = arith.truncf %84 : vector<8x128xf32> to vector<8x128xbf16>
    %c0_60 = arith.constant 0 : index
    %c0_61 = arith.constant 0 : index
    %102 = vector.load %arg5[%c0_60, %c0_61] : memref<8x128xbf16, #tpu.memory_space<vmem>>, vector<8x128xbf16>
    tpu.vector_store %arg5[%c0_60, %c0_61], %101 {strides = array<i32>} : memref<8x128xbf16, #tpu.memory_space<vmem>>, vector<8x128xbf16>,
    %c0_62 = arith.constant 0 : index
    %c0_63 = arith.constant 0 : index
    %103 = vector.load %arg6[%c0_62, %c0_63] : memref<8x128xf32, #tpu.memory_space<vmem>>, vector<8x128xf32>
    %cst_64 = arith.constant dense<0xFF800000> : vector<128xf32>
    %104 = vector.multi_reduction <maximumf>, %103, %cst_64 [0] : vector<8x128xf32> to vector<128xf32>
    %105 = vector.shape_cast %104 : vector<128xf32> to vector<1x128xf32>
    %106 = vector.broadcast %105 : vector<1x128xf32> to vector<8x128xf32>
    %107 = arith.subf %103, %106 : vector<8x128xf32>
    %108 = math.exp %107 : vector<8x128xf32>
    %cst_65 = arith.constant dense<0.000000e+00> : vector<128xf32>
    %109 = vector.multi_reduction <add>, %108, %cst_65 [0] : vector<8x128xf32> to vector<128xf32>
    %110 = vector.shape_cast %109 : vector<128xf32> to vector<1x128xf32>
    %111 = math.log %110 : vector<1x128xf32>
    %112 = arith.addf %111, %105 : vector<1x128xf32>
    %113 = vector.broadcast %112 : vector<1x128xf32> to vector<8x128xf32>
    %114 = arith.subf %103, %113 : vector<8x128xf32>
    %c0_66 = arith.constant 0 : index
    %c0_67 = arith.constant 0 : index
    %115 = vector.load %arg4[%c0_66, %c0_67] : memref<8x128xf32, #tpu.memory_space<vmem>>, vector<8x128xf32>
    tpu.vector_store %arg4[%c0_66, %c0_67], %114 {strides = array<i32>} : memref<8x128xf32, #tpu.memory_space<vmem>>, vector<8x128xf32>,
    return
  }
}

</mosaic_0001>

<bundles_post_ra>
// kernel: tpu_custom_call.1
= control target key start
LH: loop header
LB: loop body
LE: loop exit
PB: predicated region body
PF: predicated region fallthrough
CT: control target
= control target key end

     0   :  { %10 = vsyncpa [#allocation6], 0  ;;  %s887_s0 = inlined_call_operand.vmem [shape: f32[8,128], index: 0, kind: input, shape index: {}]   ;;  %s888_s1 = inlined_call_operand.hbm [shape: bf16[128,128], index: 1, kind: input, shape index: {}]   ;;  %s889_s2 = inlined_call_operand.vmem [shape: f32[8,1], index: 2, kind: input, shape index: {}]   ;;  %s890_s3 = inlined_call_operand.<no memory space> [shape: f32[1,1], index: 3, kind: input, shape index: {}]   ;;  %s891_s4 = inlined_call_operand.hbm [shape: f32[8,128], index: 4, kind: output, shape index: {}]  }
   0x1   :  { %11 = vsyncpa [#allocation7], 0  ;;  %s18_s17 = sshll.u32 %s888_s1, 4  ;;  %s804_s18 = smov [#allocation5]   ;;  %s19_s17 = int_to_ptr.hbm [resolvable:$true] %s18_s17 }
   0x2   :  { %s20_s19 = sshll.u32 %s804_s18, 4  ;;  %s805_s20 = smov 64   ;;  %s21_s19 = int_to_ptr.vmem [resolvable:$true] %s20_s19 }
   0x3   :  { %s806_s21 = smov 4  }
   0x4   :  { %26 = dma.hbm_to_vmem [thread:$0]  %s19_s17, 1024, %s21_s19, [#allocation6], %s805_s20, %s805_s20, %s806_s21  }
   0x5   :  { %800 = dma.done.wait [#allocation6], 1024  }
   0x6   :  { %801 = vsyncadd [#allocation6], 4294966272  ;;  %v697_v0 = vld [vmem:[#allocation5 + $0x38] sm:$0xff]  ;;  %v696_v1 = vld [vmem:[#allocation5 + $0x30] sm:$0xff]  ;;  %v807_v3 = vmov 0   ;;  %v860_v47 = vstv %s890_s3  ;;  %s808_s3 = smov [#allocation8]  }
   0x7   :  { %140 = vmatpush.bf16.msra.mxu0 %v697_v0  ;;  %v840_v2 = vld [vmem:[%s887_s0] sm:$0xff]  ;;  %727 = vset.pattern.permute.xlu0 %v807_v3  ;;  %v704_v7 = vld [vmem:[#allocation5 + $0x30] sm:$0xff]  ;;  %v695_v8 = vld [vmem:[#allocation5 + $0x28] sm:$0xff]  ;;  %s545_s25 = sshll.u32 %s808_s3, 4  ;;  %s547_s28 = sshll.u32 %s891_s4, 4  ;;  %s546_s25 = int_to_ptr.vmem [resolvable:$true] %s545_s25  ;;  %s548_s28 = int_to_ptr.hbm [resolvable:$true] %s547_s28 }
   0x8   :  { %v73_v4 = vpack.c.bf16 %v840_v2, %v840_v2  ;;  %v35_v5 = vld [vmem:[%s889_s2] sm:$0xff]  ;;  %v703_v9 = vld [vmem:[#allocation5 + $0x28] sm:$0xff]  ;;  %v692_v14 = vld [vmem:[#allocation5 + $0x10] sm:$0xff] }
   0x9   :  { %v705_v6 = vld [vmem:[#allocation5 + $0x38] sm:$0xff]  ;;  %40 = vperm.xlu0 %727, %v35_v5   ;;  %v694_v10 = vld [vmem:[#allocation5 + $0x20] sm:$0xff]  ;;  %v691_v15 = vld [vmem:[#allocation5 + $0x8] sm:$0xff] }
   0xa   :  { %74 = vst [vmem:[#allocation2] sm:$0xf] %v73_v4  ;;  %251 = vmatpush.bf16.msra.mxu1 %v705_v6  ;;  %v702_v11 = vld [vmem:[#allocation5 + $0x20] sm:$0xff]  ;;  %v693_v12 = vld [vmem:[#allocation5 + $0x18] sm:$0xff]  ;;  %v700_v18 = vld [vmem:[#allocation5 + $0x10] sm:$0xff] }
   0xb   :  { %141 = vmatpush.bf16.msra.mxu0 %v696_v1  ;;  %v701_v13 = vld [vmem:[#allocation5 + $0x18] sm:$0xff]  ;;  %v690_v16 = vld [vmem:[#allocation5] sm:$0xff]  ;;  %v699_v19 = vld [vmem:[#allocation5 + $0x8] sm:$0xff] }
   0xc   :  { %v698_v20 = vld [vmem:[#allocation5] sm:$0xff]  ;;  %v713_v21 = vld [vmem:[#allocation5 + $0x38] sm:$0xff]  ;;  %v712_v22 = vld [vmem:[#allocation5 + $0x30] sm:$0xff] }
   0xd   :  { %362 = vmatpush.bf16.msra.mxu2 %v713_v21  ;;  %v711_v25 = vld [vmem:[#allocation5 + $0x28] sm:$0xff]  ;;  %v710_v26 = vld [vmem:[#allocation5 + $0x20] sm:$0xff]  ;;  %v709_v29 = vld [vmem:[#allocation5 + $0x18] sm:$0xff] }
   0xe   :  { %252 = vmatpush.bf16.msra.mxu1 %v704_v7  ;;  %v708_v35 = vld [vmem:[#allocation5 + $0x10] sm:$0xff]  ;;  %v707_v38 = vld [vmem:[#allocation5 + $0x8] sm:$0xff]  ;;  %v706_v41 = vld [vmem:[#allocation5] sm:$0xff] }
   0xf   :  { %142 = vmatpush.bf16.msra.mxu0 %v695_v8  ;;  %v721_v7 = vld [vmem:[#allocation5 + $0x38] sm:$0xff] }
  0x10   :  { %473 = vmatpush.bf16.msra.mxu3 %v721_v7  ;;  %v717_v21 = vld [vmem:[#allocation5 + $0x18] sm:$0xff] }
  0x11   :  { %v75_v17 = vld [vmem:[#allocation2] sm:$0xf]  ;;  %363 = vmatpush.bf16.msra.mxu2 %v712_v22 }
  0x12   :  { %253 = vmatpush.bf16.msra.mxu1 %v703_v9 }
  0x13   :  { %143 = vmatpush.bf16.msra.mxu0 %v694_v10  ;;  %v720_v10 = vld [vmem:[#allocation5 + $0x30] sm:$0xff] }
  0x14   :  { %474 = vmatpush.bf16.msra.mxu3 %v720_v10 }
  0x15   :  { %364 = vmatpush.bf16.msra.mxu2 %v711_v25 }
  0x16   :  { %254 = vmatpush.bf16.msra.mxu1 %v702_v11 }
  0x17   :  { %144 = vmatpush.bf16.msra.mxu0 %v693_v12 }
  0x19   :  { %365 = vmatpush.bf16.msra.mxu2 %v710_v26 }
  0x1a   :  { %255 = vmatpush.bf16.msra.mxu1 %v701_v13  ;;  %v719_v13 = vld [vmem:[#allocation5 + $0x28] sm:$0xff] }
  0x1b   :  { %145 = vmatpush.bf16.msra.mxu0 %v692_v14  ;;  %475 = vmatpush.bf16.msra.mxu3 %v719_v13 }
  0x1d   :  { %366 = vmatpush.bf16.msra.mxu2 %v709_v29 }
  0x1e   :  { %256 = vmatpush.bf16.msra.mxu1 %v700_v18 }
  0x1f   :  { %146 = vmatpush.bf16.msra.mxu0 %v691_v15 }
  0x21   :  { %367 = vmatpush.bf16.msra.mxu2 %v708_v35 }
  0x22   :  { %257 = vmatpush.bf16.msra.mxu1 %v699_v19 }
  0x23   :  { %147 = vmatpush.bf16.msra.mxu0 %v690_v16 }
  0x25   :  { %368 = vmatpush.bf16.msra.mxu2 %v707_v38 }
  0x26   :  { %148 = vmatmul.bf16.vlgmr.msra.gmra.mxu0 %v75_v17  ;;  %258 = vmatpush.bf16.msra.mxu1 %v698_v20  ;;  %v718_v17 = vld [vmem:[#allocation5 + $0x20] sm:$0xff] }
  0x27   :  { %476 = vmatpush.bf16.msra.mxu3 %v718_v17 }
  0x29   :  { %369 = vmatpush.bf16.msra.mxu2 %v706_v41 }
  0x2b   :  { %477 = vmatpush.bf16.msra.mxu3 %v717_v21 }
  0x7b   :  { %v851_v30 = vpop.permute.xlu0 %40 }
  0x7c   :  { %v43_v31 = vmul.f32 %v851_v30, %v840_v2 }
  0x7e   :  { %v44_v33 = vrot.slane %v43_v31, 4 }
  0x80   :  { %v45_v36 = vadd.f32 %v44_v33, %v43_v31 }
  0x82   :  { %v46_v39 = vrot.slane %v45_v36, 2 }
  0x84   :  { %v47_v42 = vadd.f32 %v46_v39, %v45_v36 }
  0x86   :  { %v48_v44 = vrot.slane %v47_v42, 1 }
  0x88   :  { %v49_v46 = vadd.f32 %v48_v44, %v47_v42 }
  0x8a   :  { %v51_v49 = vadd.f32 %v860_v47, %v49_v46 }
  0x8c   :  { %v557_v51 = vmul.f32 -1.442695, %v51_v49 }
  0x8e   :  { %728 = vpow2.f32 %v557_v51 }
  0x94   :  { %v729_v56 = vpop.eup %728 }
  0x95   :  { %v55_v59 = vadd.f32 1.0, %v729_v56  ;;  %v714_v56 = vld [vmem:[#allocation5] sm:$0xff] }
  0x97   :  { %vm61_vm0 = vweird.f32 %v55_v59  ;;  %v67_v22 = vand.u32 2147483648, %v55_v59  ;;  %v65_v25 = vand.u32 2147483647, %v55_v59 }
  0x99   :  { %vm66_vm6 = vcmp.eq.f32.partialorder %v65_v25, 8.507059e+37 }
  0xa3   :  { %v847_v23 = vpop.f32.mrf.mxu0 }
  0xa4   :  { %v184_v24 = vpack.c.bf16 %v847_v23, %v847_v23  ;;  %v154_v32 = vmul.f32 %v847_v23, %v851_v30 }
  0xa6   :  { %185 = vst [vmem:[#allocation2] sm:$0xf] %v184_v24  ;;  %v155_v34 = vrot.slane %v154_v32, 4 }
  0xa8   :  { %v156_v37 = vadd.f32 %v155_v34, %v154_v32  ;;  %v68_v32 = vor.u32 1.1754944e-38, %v67_v22 }
  0xaa   :  { %v157_v40 = vrot.slane %v156_v37, 2 }
  0xab   :  { %v151_v27 = vpop.f32.mrf.mxu0 }
  0xac   :  { %v158_v43 = vadd.f32 %v157_v40, %v156_v37 }
  0xad   :  { %v186_v28 = vld [vmem:[#allocation2] sm:$0xf] }
  0xae   :  { %259 = vmatmul.bf16.vlgmr.msra.gmra.mxu1 %v186_v28  ;;  %v159_v45 = vrot.slane %v158_v43, 1 }
  0xb0   :  { %v160_v48 = vadd.f32 %v159_v45, %v158_v43 }
  0xb2   :  { %v161_v50 = vadd.f32 %v160_v48, %v860_v47 }
  0xb4   :  { %v590_v52 = vmul.f32 -1.442695, %v161_v50 }
  0xb6   :  { %730 = vpow2.f32 %v590_v52 }
  0xb7   :  { %732 = vrcp.f32 %v55_v59 }
  0xbc   :  { %v731_v57 = vpop.eup %730 }
  0xbd   :  { %v165_v61 = vadd.f32 1.0, %v731_v57  ;;  %v733_v5 = vpop.eup %732 }
  0xbe   :  { %v57_v11 = vmul.f32 %v733_v5, %v55_v59  ;;  %vm62_vm1 = vweird.f32 %v733_v5 }
  0xbf   :  { %734 = vrcp.f32 %v165_v61  ;;  %vm871_vm3 = vmor %vm61_vm0, %vm62_vm1  ;;  %v177_v28 = vand.u32 2147483648, %v165_v61  ;;  %vm171_vm4 = vweird.f32 %v165_v61  ;;  %v175_v29 = vand.u32 2147483647, %v165_v61 }
  0xc0   :  { %v58_v14 = vsub.f32 1.0, %v57_v11 }
  0xc1   :  { %v178_v36 = vor.u32 1.1754944e-38, %v177_v28  ;;  %vm176_vm7 = vcmp.eq.f32.partialorder %v175_v29, 8.507059e+37 }
  0xc2   :  { %v59_v19 = vmul.f32 %v733_v5, %v58_v14 }
  0xc4   :  { %v60_v24 = vadd.f32 %v733_v5, %v59_v19 }
  0xc5   :  { %v735_v8 = vpop.eup %734 }
  0xc6   :  { %v167_v12 = vmul.f32 %v735_v8, %v165_v61  ;;  %vm172_vm2 = vweird.f32 %v735_v8  ;;  %v64_v33 = vsel %vm871_vm3, %v733_v5, %v60_v24 }
  0xc7   :  { %vm173_vm5 = vmor %vm171_vm4, %vm172_vm2  ;;  %v69_v38 = vsel %vm66_vm6, %v68_v32, %v64_v33 }
  0xc8   :  { %v168_v15 = vsub.f32 1.0, %v167_v12  ;;  %v71_v43 = vmul.f32 %v69_v38, %v840_v2 }
  0xca   :  { %v169_v20 = vmul.f32 %v735_v8, %v168_v15 }
  0xcc   :  { %v170_v26 = vadd.f32 %v735_v8, %v169_v20 }
  0xce   :  { %v174_v34 = vsel %vm173_vm5, %v735_v8, %v170_v26 }
  0xcf   :  { %v179_v39 = vsel %vm176_vm7, %v178_v36, %v174_v34 }
  0xd0   :  { %v181_v44 = vmul.f32 %v179_v39, %v847_v23 }
  0xd2   :  { %v182_v50 = vadd.f32 %v181_v44, %v71_v43 }
 0x12b   :  { %v864_v53 = vpop.f32.mrf.mxu1 }
 0x12c   :  { %v265_v54 = vmul.f32 %v864_v53, %v851_v30  ;;  %v295_v55 = vpack.c.bf16 %v864_v53, %v864_v53 }
 0x12e   :  { %v266_v58 = vrot.slane %v265_v54, 4  ;;  %296 = vst [vmem:[#allocation2] sm:$0xf] %v295_v55  ;;  %v715_v55 = vld [vmem:[#allocation5 + $0x8] sm:$0xff] }
 0x130   :  { %v267_v60 = vadd.f32 %v266_v58, %v265_v54  ;;  %v716_v54 = vld [vmem:[#allocation5 + $0x10] sm:$0xff] }
 0x131   :  { %478 = vmatpush.bf16.msra.mxu3 %v716_v54 }
 0x132   :  { %v268_v62 = vrot.slane %v267_v60, 2 }
 0x133   :  { %v262_v63 = vpop.f32.mrf.mxu1 }
 0x134   :  { %v269_v0 = vadd.f32 %v268_v62, %v267_v60 }
 0x135   :  { %v297_v1 = vld [vmem:[#allocation2] sm:$0xf]  ;;  %479 = vmatpush.bf16.msra.mxu3 %v715_v55 }
 0x136   :  { %v270_v3 = vrot.slane %v269_v0, 1  ;;  %370 = vmatmul.bf16.vlgmr.msra.gmra.mxu2 %v297_v1 }
 0x138   :  { %v271_v4 = vadd.f32 %v270_v3, %v269_v0 }
 0x139   :  { %480 = vmatpush.bf16.msra.mxu3 %v714_v56 }
 0x13a   :  { %v272_v6 = vadd.f32 %v271_v4, %v860_v47 }
 0x13c   :  { %v623_v9 = vmul.f32 -1.442695, %v272_v6 }
 0x13e   :  { %736 = vpow2.f32 %v623_v9 }
 0x144   :  { %v737_v16 = vpop.eup %736 }
 0x145   :  { %v276_v18 = vadd.f32 1.0, %v737_v16 }
 0x147   :  { %738 = vrcp.f32 %v276_v18  ;;  %v288_v40 = vand.u32 2147483648, %v276_v18  ;;  %v286_v42 = vand.u32 2147483647, %v276_v18  ;;  %vm282_vm9 = vweird.f32 %v276_v18 }
 0x149   :  { %v289_v46 = vor.u32 1.1754944e-38, %v288_v40  ;;  %vm287_vm11 = vcmp.eq.f32.partialorder %v286_v42, 8.507059e+37 }
 0x14d   :  { %v739_v31 = vpop.eup %738 }
 0x14e   :  { %v278_v35 = vmul.f32 %v739_v31, %v276_v18  ;;  %vm283_vm8 = vweird.f32 %v739_v31 }
 0x14f   :  { %vm284_vm10 = vmor %vm282_vm9, %vm283_vm8 }
 0x150   :  { %v279_v37 = vsub.f32 1.0, %v278_v35 }
 0x152   :  { %v280_v41 = vmul.f32 %v739_v31, %v279_v37 }
 0x154   :  { %v281_v45 = vadd.f32 %v739_v31, %v280_v41 }
 0x156   :  { %v285_v48 = vsel %vm284_vm10, %v739_v31, %v281_v45 }
 0x157   :  { %v290_v49 = vsel %vm287_vm11, %v289_v46, %v285_v48 }
 0x158   :  { %v292_v51 = vmul.f32 %v290_v49, %v864_v53 }
 0x15a   :  { %v293_v52 = vadd.f32 %v292_v51, %v182_v50 }
 0x1b9   :  { %v371_v2 = vpop.f32.mrf.mxu2 }
 0x1ba   :  { %v376_v23 = vmul.f32 %v371_v2, %v851_v30  ;;  %v406_v57 = vpack.c.bf16 %v371_v2, %v371_v2 }
 0x1bc   :  { %v377_v58 = vrot.slane %v376_v23, 4  ;;  %407 = vst [vmem:[#allocation2] sm:$0xf] %v406_v57 }
 0x1be   :  { %v378_v59 = vadd.f32 %v377_v58, %v376_v23 }
 0x1c0   :  { %v379_v60 = vrot.slane %v378_v59, 2 }
 0x1c1   :  { %v373_v61 = vpop.f32.mrf.mxu2 }
 0x1c2   :  { %v380_v62 = vadd.f32 %v379_v60, %v378_v59 }
 0x1c3   :  { %v408_v63 = vld [vmem:[#allocation2] sm:$0xf] }
 0x1c4   :  { %v381_v0 = vrot.slane %v380_v62, 1  ;;  %481 = vmatmul.bf16.vlgmr.msra.gmra.mxu3 %v408_v63 }
 0x1c6   :  { %v382_v53 = vadd.f32 %v381_v0, %v380_v62 }
 0x1c8   :  { %v383_v1 = vadd.f32 %v382_v53, %v860_v47 }
 0x1ca   :  { %v656_v3 = vmul.f32 -1.442695, %v383_v1 }
 0x1cc   :  { %740 = vpow2.f32 %v656_v3 }
 0x1d2   :  { %v741_v4 = vpop.eup %740 }
 0x1d3   :  { %v387_v5 = vadd.f32 1.0, %v741_v4 }
 0x1d5   :  { %742 = vrcp.f32 %v387_v5  ;;  %v399_v9 = vand.u32 2147483648, %v387_v5  ;;  %v397_v11 = vand.u32 2147483647, %v387_v5  ;;  %vm393_vm13 = vweird.f32 %v387_v5 }
 0x1d7   :  { %v400_v13 = vor.u32 1.1754944e-38, %v399_v9  ;;  %vm398_vm15 = vcmp.eq.f32.partialorder %v397_v11, 8.507059e+37 }
 0x1db   :  { %v743_v6 = vpop.eup %742 }
 0x1dc   :  { %v389_v7 = vmul.f32 %v743_v6, %v387_v5  ;;  %vm394_vm12 = vweird.f32 %v743_v6 }
 0x1dd   :  { %vm395_vm14 = vmor %vm393_vm13, %vm394_vm12 }
 0x1de   :  { %v390_v8 = vsub.f32 1.0, %v389_v7 }
 0x1e0   :  { %v391_v10 = vmul.f32 %v743_v6, %v390_v8 }
 0x1e2   :  { %v392_v12 = vadd.f32 %v743_v6, %v391_v10 }
 0x1e4   :  { %v396_v14 = vsel %vm395_vm14, %v743_v6, %v392_v12 }
 0x1e5   :  { %v401_v15 = vsel %vm398_vm15, %v400_v13, %v396_v14 }
 0x1e6   :  { %v403_v16 = vmul.f32 %v401_v15, %v371_v2 }
 0x1e8   :  { %v404_v17 = vadd.f32 %v403_v16, %v293_v52 }
 0x247   :  { %v482_v18 = vpop.f32.mrf.mxu3 }
 0x248   :  { %v487_v19 = vmul.f32 %v482_v18, %v851_v30  ;;  %v517_v20 = vpack.c.bf16 %v482_v18, %v482_v18 }
 0x24a   :  { %v488_v21 = vrot.slane %v487_v19, 4  ;;  %518 = vst [vmem:[#allocation2] sm:$0xf] %v517_v20 }
 0x24c   :  { %v489_v22 = vadd.f32 %v488_v21, %v487_v19 }
 0x24e   :  { %v490_v24 = vrot.slane %v489_v22, 2 }
 0x24f   :  { %v484_v25 = vpop.f32.mrf.mxu3 }
 0x250   :  { %v491_v26 = vadd.f32 %v490_v24, %v489_v22 }
 0x252   :  { %v492_v27 = vrot.slane %v491_v26, 1 }
 0x254   :  { %v493_v28 = vadd.f32 %v492_v27, %v491_v26 }
 0x256   :  { %v494_v29 = vadd.f32 %v493_v28, %v860_v47 }
 0x258   :  { %v689_v31 = vmul.f32 -1.442695, %v494_v29 }
 0x25a   :  { %744 = vpow2.f32 %v689_v31 }
 0x260   :  { %v745_v32 = vpop.eup %744 }
 0x261   :  { %v498_v33 = vadd.f32 1.0, %v745_v32 }
 0x263   :  { %746 = vrcp.f32 %v498_v33  ;;  %v510_v30 = vand.u32 2147483648, %v498_v33  ;;  %v508_v38 = vand.u32 2147483647, %v498_v33  ;;  %vm504_vm1 = vweird.f32 %v498_v33 }
 0x265   :  { %v511_v40 = vor.u32 1.1754944e-38, %v510_v30  ;;  %vm509_vm3 = vcmp.eq.f32.partialorder %v508_v38, 8.507059e+37 }
 0x269   :  { %v747_v34 = vpop.eup %746 }
 0x26a   :  { %v500_v35 = vmul.f32 %v747_v34, %v498_v33  ;;  %vm505_vm0 = vweird.f32 %v747_v34 }
 0x26b   :  { %vm506_vm2 = vmor %vm504_vm1, %vm505_vm0 }
 0x26c   :  { %v501_v36 = vsub.f32 1.0, %v500_v35 }
 0x26e   :  { %v502_v37 = vmul.f32 %v747_v34, %v501_v36 }
 0x270   :  { %v503_v39 = vadd.f32 %v747_v34, %v502_v37 }
 0x272   :  { %v507_v41 = vsel %vm506_vm2, %v747_v34, %v503_v39 }
 0x273   :  { %v512_v42 = vsel %vm509_vm3, %v511_v40, %v507_v41 }
 0x274   :  { %v514_v47 = vmul.f32 %v512_v42, %v482_v18 }
 0x276   :  { %v515_v43 = vadd.f32 %v514_v47, %v404_v17 }
 0x278   :  { %v520_v44 = vrot.slane %v515_v43, 4 }
 0x27a   :  { %v521_v45 = vmax.f32 %v515_v43, %v520_v44 }
 0x27c   :  { %v522_v46 = vrot.slane %v521_v45, 2 }
 0x27e   :  { %v523_v48 = vmax.f32 %v521_v45, %v522_v46 }
 0x280   :  { %v524_v49 = vrot.slane %v523_v48, 1 }
 0x282   :  { %v525_v50 = vmax.f32 %v523_v48, %v524_v49 }
 0x284   :  { %v526_v51 = vsub.f32 %v515_v43, %v525_v50 }
 0x286   :  { %v527_v52 = vmul.f32 1.442695, %v526_v51 }
 0x288   :  { %748 = vpow2.f32 %v527_v52 }
 0x28e   :  { %v749_v54 = vpop.eup %748 }
 0x28f   :  { %v529_v55 = vrot.slane %v749_v54, 4 }
 0x291   :  { %v530_v56 = vadd.f32 %v749_v54, %v529_v55 }
 0x293   :  { %v531_v2 = vrot.slane %v530_v56, 2 }
 0x295   :  { %v532_v23 = vadd.f32 %v531_v2, %v530_v56 }
 0x297   :  { %v533_v57 = vrot.slane %v532_v23, 1 }
 0x299   :  { %v534_v58 = vadd.f32 %v533_v57, %v532_v23 }
 0x29b   :  { %750 = vlog2.f32 %v534_v58 }
 0x2a1   :  { %v751_v59 = vpop.eup %750 }
 0x2a2   :  { %v536_v60 = vmul.f32 0.6931472, %v751_v59 }
 0x2a4   :  { %v537_v61 = vadd.f32 %v536_v60, %v525_v50 }
 0x2a6   :  { %v538_v62 = vsub.f32 %v515_v43, %v537_v61 }
 0x2a8   :  { %539 = vst [vmem:[#allocation8] sm:$0xff] %v538_v62 }
 0x2a9   :  { %550 = dma.vmem_to_hbm [thread:$0]  %s546_s25, 128, %s548_s28, [#allocation7]  }
 0x2aa   :  { %802 = dma.done.wait [#allocation7], 128  }
 0x2ab   :  { %803 = vsyncadd [#allocation7], 4294967168 }
 0x2ac   :  { %555 = vsyncpa [#allocation6], 1 }
 0x2ad   :  { %556 = vsyncpa [#allocation7], 1 }

</bundles_post_ra>
